<compile_context>
chip_gen: v6e
topology: v6e:2x2x1
jax: 0.10.0
libtpu: 0.0.40
codegen_flags: <defaults>
</compile_context>

<pallas_src>
import jax
import jax.numpy as jnp
from jax.experimental import pallas as pl
from jax.experimental.pallas import tpu as pltpu

IN_FEATURES = 784
HIDDEN = 250
OUT_FEATURES = 10
HIDDEN_PAD = 256   # next multiple of 128 -> clean MXU tile / lane-dense hidden
OUT_PAD = 128      # lane-dense output block; real logits live in lanes [0, 10)
NEG_BIG = -1e30    # baked into padded b2 lanes to kill them before max/logsumexp


def netfull_kernel(x_ref, w1_ref, b1_ref, w2_ref, b2_ref, o_ref):
    # ---- Layer 1: (TB, 784) @ (784, 256) on the MXU, f32 accumulation ----
    # x arrives f32 from HBM; cast to bf16 only at the MXU input (no extra HBM pass).
    x = x_ref[...].astype(jnp.bfloat16)
    h = jnp.dot(x, w1_ref[...], preferred_element_type=jnp.float32)
    h = jnp.tanh(h + b1_ref[...])  # f32 elementwise (VPU + EUP)

    # ---- Layer 2: (TB, 256) @ (256, 128), a single bf16 MXU tile ----
    # b2's padded lanes carry -1e30 (and w2's padded columns are zero), so the padded
    # logits are already ~-1e30 here: no iota/compare/select needed.
    logits = jnp.dot(h.astype(jnp.bfloat16), w2_ref[...],
                     preferred_element_type=jnp.float32) + b2_ref[...]

    # ---- Numerically stable LogSoftmax(dim=-1) ----
    m = jnp.max(logits, axis=-1, keepdims=True)
    shifted = logits - m
    lse = jnp.log(jnp.sum(jnp.exp(shifted), axis=-1, keepdims=True))
    o_ref[...] = (shifted - lse).astype(o_ref.dtype)


def _round_up(n, m):
    return ((n + m - 1) // m) * m


def _pad_params(w1, b1, w2, b2):
    """Zero-pad params once to MXU/lane-friendly shapes; weights to bf16 for the MXU.

    b2's padded lanes get a large negative bias so padded logits are masked "for free".
    """
    w1p = jnp.pad(w1, ((0, 0), (0, HIDDEN_PAD - HIDDEN))).astype(jnp.bfloat16)
    b1p = jnp.pad(b1.reshape(1, -1), ((0, 0), (0, HIDDEN_PAD - HIDDEN))).astype(jnp.float32)
    w2p = jnp.pad(w2, ((0, HIDDEN_PAD - HIDDEN), (0, OUT_PAD - OUT_FEATURES))).astype(jnp.bfloat16)
    b2p = jnp.pad(b2.reshape(1, -1), ((0, 0), (0, OUT_PAD - OUT_FEATURES)),
                  constant_values=NEG_BIG).astype(jnp.float32)
    return w1p, b1p, w2p, b2p


def net_full_forward(x, w1, b1, w2, b2, *, tile_batch=1024):
    """x: any shape flattening to (-1, 784). Weights stored as (in, out). Returns (B, 10)."""
    x2 = x.reshape(-1, IN_FEATURES)
    B = x2.shape[0]

    # Batch tile:
    #  * aim for >=2 grid steps so v7x's two TensorCores both get work,
    #  * floor ~128 rows so per-step overhead (~0.35 us) stays amortized,
    #  * multiple of 16 for sublane packing, capped at tile_batch (VMEM budget),
    #  * never larger than the (rounded) batch for tiny inputs.
    tb = _round_up(pl.cdiv(B, 2), 16)
    tb = max(tb, 128)
    tb = min(tb, int(tile_batch))
    tb = min(tb, _round_up(B, 16))
    grid = pl.cdiv(B, tb)  # ragged last block handled by Pallas masked reads/writes

    w1p, b1p, w2p, b2p = _pad_params(w1, b1, w2, b2)

    param_bytes = (w1p.size * 2 + b1p.size * 4 + w2p.size * 2 + b2p.size * 4)
    cost = pl.CostEstimate(
        flops=2 * B * (IN_FEATURES * HIDDEN_PAD + HIDDEN_PAD * OUT_PAD),
        transcendentals=B * (HIDDEN_PAD + OUT_PAD),
        bytes_accessed=B * IN_FEATURES * x2.dtype.itemsize
                       + param_bytes + B * OUT_PAD * 4,
    )

    # Working set: double-buffered x + out blocks, weights resident (x2 for buffers),
    # plus a few MiB of headroom for internal scratch. Keeps v7x's 64 MiB VMEM free.
    x_block_bytes = tb * IN_FEATURES * x2.dtype.itemsize
    out_block_bytes = tb * OUT_PAD * 4
    vmem_limit = max(16 << 20,
                     2 * (x_block_bytes + out_block_bytes) + 2 * param_bytes + (4 << 20))

    out = pl.pallas_call(
        netfull_kernel,
        out_shape=jax.ShapeDtypeStruct((B, OUT_PAD), jnp.float32),
        grid=(grid,),
        in_specs=[
            pl.BlockSpec((tb, IN_FEATURES), lambda i: (i, 0)),          # x: batch-tiled
            pl.BlockSpec((IN_FEATURES, HIDDEN_PAD), lambda i: (0, 0)),  # w1: VMEM-resident
            pl.BlockSpec((1, HIDDEN_PAD), lambda i: (0, 0)),            # b1
            pl.BlockSpec((HIDDEN_PAD, OUT_PAD), lambda i: (0, 0)),      # w2
            pl.BlockSpec((1, OUT_PAD), lambda i: (0, 0)),               # b2 (-1e30 pad lanes)
        ],
        out_specs=pl.BlockSpec((tb, OUT_PAD), lambda i: (i, 0)),
        compiler_params=pltpu.CompilerParams(
            dimension_semantics=("parallel",),   # shard batch across TCs on v7x
            vmem_limit_bytes=int(vmem_limit),
        ),
        cost_estimate=cost,
    )(x2, w1p, b1p, w2p, b2p)

    # One small column slice; padded lanes (>=10) hold ~(-1e30 - lse) and are dropped here.
    return out[:, :OUT_FEATURES]


def init_params(key):
    """PyTorch nn.Linear-style init: U(-1/sqrt(fan_in), 1/sqrt(fan_in)); weights stored (in, out)."""
    k1, k2, k3, k4 = jax.random.split(key, 4)
    bound1 = 1.0 / jnp.sqrt(784.0)
    bound2 = 1.0 / jnp.sqrt(250.0)
    w1 = jax.random.uniform(k1, (IN_FEATURES, HIDDEN), jnp.float32, -bound1, bound1)
    b1 = jax.random.uniform(k2, (HIDDEN,), jnp.float32, -bound1, bound1)
    w2 = jax.random.uniform(k3, (HIDDEN, OUT_FEATURES), jnp.float32, -bound2, bound2)
    b2 = jax.random.uniform(k4, (OUT_FEATURES,), jnp.float32, -bound2, bound2)
    return w1, b1, w2, b2


def reference_forward(x, w1, b1, w2, b2):
    """Pure-JAX reference matching the kernel's math (bf16 MXU inputs, f32 accumulate)."""
    x2 = x.reshape(-1, IN_FEATURES).astype(jnp.bfloat16)
    h = jnp.tanh(
        jnp.dot(x2, w1.astype(jnp.bfloat16), preferred_element_type=jnp.float32)
        + b1.reshape(1, -1))
    logits = jnp.dot(h.astype(jnp.bfloat16), w2.astype(jnp.bfloat16),
                     preferred_element_type=jnp.float32) + b2.reshape(1, -1)
    return jax.nn.log_softmax(logits, axis=-1)


if __name__ == "__main__":
    key = jax.random.PRNGKey(0)
    kx, kp = jax.random.split(key)
    # MNIST-like NCHW input, small batch.
    x = jax.random.normal(kx, (2, 1, 28, 28), jnp.float32)
    w1, b1, w2, b2 = init_params(kp)

    out = net_full_forward(x, w1, b1, w2, b2)
    out = jax.block_until_ready(out)

    ref = reference_forward(x, w1, b1, w2, b2)
    assert out.shape == (2, OUT_FEATURES), out.shape
    assert bool(jnp.all(jnp.isfinite(out))), "non-finite log-probs"
    assert jnp.allclose(out, ref, atol=1e-3, rtol=1e-3), "mismatch vs JAX reference"

    print("KERNEL_OK")
</pallas_src>

<mosaic_0001>
module attributes {stable_mosaic.version = 11 : i64} {
  func.func @netfull_kernel(%arg0: i32, %arg1: memref<16x784xf32, #tpu.memory_space<vmem>>, %arg2: memref<784x256xbf16, #tpu.memory_space<vmem>>, %arg3: memref<1x256xf32, #tpu.memory_space<vmem>>, %arg4: memref<256x128xbf16, #tpu.memory_space<vmem>>, %arg5: memref<1x128xf32, #tpu.memory_space<vmem>>, %arg6: memref<16x128xf32, #tpu.memory_space<vmem>>) attributes {dimension_semantics = [#tpu.dimension_semantics<parallel>], iteration_bounds = array<i64: 1>, scalar_prefetch = 0 : i64, scratch_operands = 0 : i64, tpu.core_type = #tpu.core_type<tc>, window_params = [{transform_indices = @transform_0, window_bounds = array<i64: 16, 784>}, {pipeline_mode = #tpu.pipeline_mode<synchronous>, transform_indices = @transform_1, window_bounds = array<i64: 784, 256>}, {pipeline_mode = #tpu.pipeline_mode<synchronous>, transform_indices = @transform_2, window_bounds = array<i64: 1, 256>}, {pipeline_mode = #tpu.pipeline_mode<synchronous>, transform_indices = @transform_3, window_bounds = array<i64: 256, 128>}, {pipeline_mode = #tpu.pipeline_mode<synchronous>, transform_indices = @transform_4, window_bounds = array<i64: 1, 128>}, {transform_indices = @transform_5, window_bounds = array<i64: 16, 128>}]} {
    %c0 = arith.constant 0 : index
    %c0_0 = arith.constant 0 : index
    %0 = vector.load %arg1[%c0, %c0_0] : memref<16x784xf32, #tpu.memory_space<vmem>>, vector<16x784xf32>
    %1 = arith.truncf %0 : vector<16x784xf32> to vector<16x784xbf16>
    %c0_1 = arith.constant 0 : index
    %c0_2 = arith.constant 0 : index
    %2 = vector.load %arg2[%c0_1, %c0_2] : memref<784x256xbf16, #tpu.memory_space<vmem>>, vector<784x256xbf16>
    %cst = arith.constant dense<0.000000e+00> : vector<16x256xf32>
    %3 = tpu.matmul %1, %2, %cst {dimension_numbers = #tpu.dot_dimension_numbers<[1], [0], [0], [1], [0, 0, 1, 1], [], []>} : vector<16x784xbf16>, vector<784x256xbf16>, vector<16x256xf32> -> vector<16x256xf32>
    %c0_3 = arith.constant 0 : index
    %c0_4 = arith.constant 0 : index
    %4 = vector.load %arg3[%c0_3, %c0_4] : memref<1x256xf32, #tpu.memory_space<vmem>>, vector<1x256xf32>
    %5 = vector.broadcast %4 : vector<1x256xf32> to vector<16x256xf32>
    %6 = arith.addf %3, %5 : vector<16x256xf32>
    %7 = math.tanh %6 : vector<16x256xf32>
    %8 = arith.truncf %7 : vector<16x256xf32> to vector<16x256xbf16>
    %c0_5 = arith.constant 0 : index
    %c0_6 = arith.constant 0 : index
    %9 = vector.load %arg4[%c0_5, %c0_6] : memref<256x128xbf16, #tpu.memory_space<vmem>>, vector<256x128xbf16>
    %cst_7 = arith.constant dense<0.000000e+00> : vector<16x128xf32>
    %10 = tpu.matmul %8, %9, %cst_7 {dimension_numbers = #tpu.dot_dimension_numbers<[1], [0], [0], [1], [0, 0, 1, 1], [], []>} : vector<16x256xbf16>, vector<256x128xbf16>, vector<16x128xf32> -> vector<16x128xf32>
    %c0_8 = arith.constant 0 : index
    %c0_9 = arith.constant 0 : index
    %11 = vector.load %arg5[%c0_8, %c0_9] : memref<1x128xf32, #tpu.memory_space<vmem>>, vector<1x128xf32>
    %12 = vector.broadcast %11 : vector<1x128xf32> to vector<16x128xf32>
    %13 = arith.addf %10, %12 : vector<16x128xf32>
    %cst_10 = arith.constant dense<0xFF800000> : vector<16xf32>
    %14 = vector.multi_reduction <maximumf>, %13, %cst_10 [1] : vector<16x128xf32> to vector<16xf32>
    %15 = vector.shape_cast %14 : vector<16xf32> to vector<16x1xf32>
    %16 = vector.broadcast %15 : vector<16x1xf32> to vector<16x128xf32>
    %17 = arith.subf %13, %16 : vector<16x128xf32>
    %18 = math.exp %17 : vector<16x128xf32>
    %cst_11 = arith.constant dense<0.000000e+00> : vector<16xf32>
    %19 = vector.multi_reduction <add>, %18, %cst_11 [1] : vector<16x128xf32> to vector<16xf32>
    %20 = vector.shape_cast %19 : vector<16xf32> to vector<16x1xf32>
    %21 = math.log %20 : vector<16x1xf32>
    %22 = vector.broadcast %21 : vector<16x1xf32> to vector<16x128xf32>
    %23 = arith.subf %17, %22 : vector<16x128xf32>
    %c0_12 = arith.constant 0 : index
    %c0_13 = arith.constant 0 : index
    %24 = vector.load %arg6[%c0_12, %c0_13] : memref<16x128xf32, #tpu.memory_space<vmem>>, vector<16x128xf32>
    tpu.vector_store %arg6[%c0_12, %c0_13], %23 {strides = array<i32>} : memref<16x128xf32, #tpu.memory_space<vmem>>, vector<16x128xf32>,
    return
  }
  func.func @transform_0(%arg0: i32) -> (i32, i32) {
    %c0_i32 = arith.constant 0 : i32
    %c0_i32_0 = arith.constant 0 : i32
    return %arg0, %c0_i32 : i32, i32
  }
  func.func @transform_1(%arg0: i32) -> (i32, i32) {
    %c0_i32 = arith.constant 0 : i32
    %c0_i32_0 = arith.constant 0 : i32
    %c0_i32_1 = arith.constant 0 : i32
    return %c0_i32, %c0_i32_0 : i32, i32
  }
  func.func @transform_2(%arg0: i32) -> (i32, i32) {
    %c0_i32 = arith.constant 0 : i32
    %c0_i32_0 = arith.constant 0 : i32
    %c0_i32_1 = arith.constant 0 : i32
    return %c0_i32, %c0_i32_0 : i32, i32
  }
  func.func @transform_3(%arg0: i32) -> (i32, i32) {
    %c0_i32 = arith.constant 0 : i32
    %c0_i32_0 = arith.constant 0 : i32
    %c0_i32_1 = arith.constant 0 : i32
    return %c0_i32, %c0_i32_0 : i32, i32
  }
  func.func @transform_4(%arg0: i32) -> (i32, i32) {
    %c0_i32 = arith.constant 0 : i32
    %c0_i32_0 = arith.constant 0 : i32
    %c0_i32_1 = arith.constant 0 : i32
    return %c0_i32, %c0_i32_0 : i32, i32
  }
  func.func @transform_5(%arg0: i32) -> (i32, i32) {
    %c0_i32 = arith.constant 0 : i32
    %c0_i32_0 = arith.constant 0 : i32
    return %arg0, %c0_i32 : i32, i32
  }
}

</mosaic_0001>

<bundles_post_ra>
// kernel: tpu_custom_call.1
= control target key start
LH: loop header
LB: loop body
LE: loop exit
PB: predicated region body
PF: predicated region fallthrough
CT: control target
= control target key end

     0   :  { %10 = vsyncpa [#allocation3], 0  ;;  %s1783_s0 = inlined_call_operand.hbm [shape: f32[2,784], index: 0, kind: input, shape index: {}]   ;;  %s1784_s1 = inlined_call_operand.hbm [shape: bf16[784,256], index: 1, kind: input, shape index: {}]   ;;  %s1785_s2 = inlined_call_operand.vmem [shape: f32[1,256], index: 2, kind: input, shape index: {}]   ;;  %s1786_s3 = inlined_call_operand.hbm [shape: bf16[256,128], index: 3, kind: input, shape index: {}]   ;;  %s1787_s4 = inlined_call_operand.vmem [shape: f32[1,128], index: 4, kind: input, shape index: {}]   ;;  %s1788_s5 = inlined_call_operand.hbm [shape: f32[2,128], index: 5, kind: output, shape index: {}]  }
   0x1   :  { %11 = vsyncpa [#allocation6], 0 }
   0x2   :  { %12 = vsyncpa [#allocation4], 0 }
   0x3   :  { %17 = vsyncadd [#allocation3], 1568  ;;  %s1697_s18 = smov [#allocation5]  }
   0x4   :  { %s30_s19 = sshll.u32 %s1697_s18, 4  ;;  %s31_s19 = int_to_ptr.vmem [resolvable:$true] %s30_s19 }
   0x5   :  { %s1619_s20 = scalar_lea.vmem %s31_s19, 12544  ;;  %p1624_p1 = scmp.lt.s32.totalorder %s31_s19, %s31_s19 }
   0x6   :  { %p1620_p0 = scmp.ne.s32.totalorder %s31_s19, %s1619_s20  ;;  %p1625_p2 = scmp.lt.s32.totalorder %s1619_s20, %s1619_s20 }
   0x8   :  { %p1626_p3 = por %p1625_p2, %p1624_p1 }
   0xa   :  { %p1627_p4 = pnand %p1626_p3, %p1620_p0 }
   0xc   :  { %1630 = shalt.err (!%p1627_p4)
}
   0xd   :  { %s1698_s21 = smov 128   ;;  %s1699_s22 = smov 8  }
   0xe   :  { %36 = dma.hbm_to_vmem [thread:$0]  %s1784_s1, 12544, %s31_s19, [#allocation6], %s1698_s21, %s1698_s21, %s1699_s22  }
   0xf   :  { %s1700_s25 = smov [#allocation2]  }
  0x10   :  { %s18_s26 = sshll.u32 %s1700_s25, 4  ;;  %s19_s26 = int_to_ptr.vmem [resolvable:$true] %s18_s26 }
  0x11   :  { %s1639_s27 = scalar_lea.vmem %s19_s26, 224  ;;  %s1643_s28 = scalar_lea.vmem %s19_s26, 1792 }
  0x12   :  { %p1640_p5 = scmp.ne.s32.totalorder %s19_s26, %s1639_s27  ;;  %p1644_p6 = scmp.lt.s32.totalorder %s19_s26, %s19_s26 }
  0x13   :  { %p1645_p7 = scmp.lt.s32.totalorder %s1643_s28, %s1639_s27 }
  0x15   :  { %p1646_p8 = por %p1645_p7, %p1644_p6 }
  0x17   :  { %p1647_p9 = pnand %p1646_p8, %p1640_p5 }
  0x19   :  { %1650 = shalt.err (!%p1647_p9)
}
  0x1a   :  { %s1701_s29 = smov 224   ;;  %s1702_s30 = smov 14  }
  0x1b   :  { %24 = dma.hbm_to_vmem [thread:$0]  %s1783_s0, 224, %s19_s26, [#allocation3], %s1701_s29, %s1701_s29, %s1702_s30  }
  0x1c   :  { %s1703_s8 = smov [#allocation7]  }
  0x1d   :  { %s44_s9 = sshll.u32 %s1703_s8, 4  ;;  %s45_s9 = int_to_ptr.vmem [resolvable:$true] %s44_s9 }
  0x1e   :  { %s1659_s1 = scalar_lea.vmem %s45_s9, 2048  ;;  %p1664_p11 = scmp.lt.s32.totalorder %s45_s9, %s45_s9 }
  0x1f   :  { %p1660_p10 = scmp.ne.s32.totalorder %s45_s9, %s1659_s1  ;;  %p1665_p12 = scmp.lt.s32.totalorder %s1659_s1, %s1659_s1 }
  0x21   :  { %p1666_p13 = por %p1665_p12, %p1664_p11 }
  0x23   :  { %p1667_p0 = pnand %p1666_p13, %p1660_p10 }
  0x25   :  { %1670 = shalt.err (!%p1667_p0)
}
  0x26   :  { %s1704_s10 = smov 64   ;;  %s1705_s11 = smov 4  }
  0x27   :  { %50 = dma.hbm_to_vmem [thread:$0]  %s1786_s3, 2048, %s45_s9, [#allocation6], %s1704_s10, %s1704_s10, %s1705_s11  }
  0x28   :  { %1691 = dma.done.wait [#allocation3], 1792  }
  0x29   :  { %1692 = vsyncadd [#allocation3], 4294965504 }
  0x2a   :  { %1693 = dma.done.wait [#allocation6], 14592  }
  0x2b   :  { %1694 = vsyncadd [#allocation6], 4294952704  ;;  %v1408_v0 = vld [vmem:[#allocation5 + $0x74] ss:$8 sps:$4 sm:$0xff]   ;;  %v1410_v1 = vld [vmem:[#allocation5 + $0x70] ss:$8 sps:$4 sm:$0xff]   ;;  %v102_v41 = vlaneseq }
  0x2c   :  { %862 = vmatprep.subr.bf16.mxu0 %v1408_v0  ;;  %v1411_v2 = vld [vmem:[#allocation5 + $0x174] ss:$8 sps:$4 sm:$0xff]   ;;  %v1413_v3 = vld [vmem:[#allocation5 + $0x170] ss:$8 sps:$4 sm:$0xff]   ;;  %v1414_v4 = vld [vmem:[#allocation5 + $0x64] ss:$8 sps:$4 sm:$0xff]  }
  0x2d   :  { %863 = vmatpush1.bf16.msra.mxu0 %v1410_v1  ;;  %v1416_v5 = vld [vmem:[#allocation5 + $0x60] ss:$8 sps:$4 sm:$0xff]   ;;  %905 = vmatprep.subr.bf16.mxu1 %v1411_v2  ;;  %v1417_v6 = vld [vmem:[#allocation5 + $0x164] ss:$8 sps:$4 sm:$0xff]   ;;  %v1420_v8 = vld [vmem:[#allocation5 + $0x54] ss:$8 sps:$4 sm:$0xff]  }
  0x2e   :  { %906 = vmatpush1.bf16.msra.mxu1 %v1413_v3  ;;  %864 = vmatprep.subr.bf16.mxu0 %v1414_v4  ;;  %v1419_v7 = vld [vmem:[#allocation5 + $0x160] ss:$8 sps:$4 sm:$0xff]   ;;  %v1422_v9 = vld [vmem:[#allocation5 + $0x50] ss:$8 sps:$4 sm:$0xff]   ;;  %v1423_v10 = vld [vmem:[#allocation5 + $0x154] ss:$8 sps:$4 sm:$0xff]  }
  0x2f   :  { %907 = vmatprep.subr.bf16.mxu1 %v1417_v6  ;;  %v1426_v11 = vld [vmem:[#allocation5 + $0x44] ss:$8 sps:$4 sm:$0xff]   ;;  %v1425_v12 = vld [vmem:[#allocation5 + $0x150] ss:$8 sps:$4 sm:$0xff]   ;;  %v1428_v14 = vld [vmem:[#allocation5 + $0x40] ss:$8 sps:$4 sm:$0xff]  }
  0x30   :  { %v1429_v13 = vld [vmem:[#allocation5 + $0x144] ss:$8 sps:$4 sm:$0xff]   ;;  %v1432_v15 = vld [vmem:[#allocation5 + $0x34] ss:$8 sps:$4 sm:$0xff]   ;;  %v1431_v16 = vld [vmem:[#allocation5 + $0x140] ss:$8 sps:$4 sm:$0xff]  }
  0x31   :  { %865 = vmatpush1.bf16.msra.mxu0 %v1416_v5  ;;  %v1435_v17 = vld [vmem:[#allocation5 + $0x134] ss:$8 sps:$4 sm:$0xff]   ;;  %v1434_v18 = vld [vmem:[#allocation5 + $0x30] ss:$8 sps:$4 sm:$0xff]   ;;  %v1438_v19 = vld [vmem:[#allocation5 + $0x24] ss:$8 sps:$4 sm:$0xff]  }
  0x32   :  { %866 = vmatprep.subr.bf16.mxu0 %v1420_v8  ;;  %908 = vmatpush1.bf16.msra.mxu1 %v1419_v7  ;;  %v1437_v20 = vld [vmem:[#allocation5 + $0x130] ss:$8 sps:$4 sm:$0xff]   ;;  %v1441_v21 = vld [vmem:[#allocation5 + $0x124] ss:$8 sps:$4 sm:$0xff]   ;;  %v1440_v22 = vld [vmem:[#allocation5 + $0x20] ss:$8 sps:$4 sm:$0xff]  }
  0x33   :  { %909 = vmatprep.subr.bf16.mxu1 %v1423_v10  ;;  %v1444_v23 = vld [vmem:[#allocation5 + $0x14] ss:$8 sps:$4 sm:$0xff]   ;;  %v1443_v24 = vld [vmem:[#allocation5 + $0x120] ss:$8 sps:$4 sm:$0xff]   ;;  %v1446_v26 = vld [vmem:[#allocation5 + $0x10] ss:$8 sps:$4 sm:$0xff]  }
  0x34   :  { %v1447_v25 = vld [vmem:[#allocation5 + $0x114] ss:$8 sps:$4 sm:$0xff]   ;;  %v1450_v27 = vld [vmem:[#allocation5 + $0x4] ss:$8 sps:$4 sm:$0xff]   ;;  %v1449_v28 = vld [vmem:[#allocation5 + $0x110] ss:$8 sps:$4 sm:$0xff]  }
  0x35   :  { %867 = vmatpush1.bf16.msra.mxu0 %v1422_v9  ;;  %v1453_v29 = vld [vmem:[#allocation5 + $0x104] ss:$8 sps:$4 sm:$0xff]   ;;  %v1452_v30 = vld [vmem:[#allocation5] ss:$8 sps:$4 sm:$0xff]   ;;  %v1456_v31 = vld [vmem:[#allocation5 + $0xf4] ss:$8 sps:$4 sm:$0xff]  }
  0x36   :  { %868 = vmatprep.subr.bf16.mxu0 %v1426_v11  ;;  %910 = vmatpush1.bf16.msra.mxu1 %v1425_v12  ;;  %v1455_v32 = vld [vmem:[#allocation5 + $0x100] ss:$8 sps:$4 sm:$0xff]   ;;  %v1459_v33 = vld [vmem:[#allocation5 + $0x1f4] ss:$8 sps:$4 sm:$0xff]   ;;  %v1458_v34 = vld [vmem:[#allocation5 + $0xf0] ss:$8 sps:$4 sm:$0xff]  }
  0x37   :  { %911 = vmatprep.subr.bf16.mxu1 %v1429_v13  ;;  %v1462_v35 = vld [vmem:[#allocation5 + $0xe4] ss:$8 sps:$4 sm:$0xff]   ;;  %v1461_v36 = vld [vmem:[#allocation5 + $0x1f0] ss:$8 sps:$4 sm:$0xff]   ;;  %v1464_v38 = vld [vmem:[#allocation5 + $0xe0] ss:$8 sps:$4 sm:$0xff]  }
  0x38   :  { %v1465_v37 = vld [vmem:[#allocation5 + $0x1e4] ss:$8 sps:$4 sm:$0xff]   ;;  %v1706_v39 = vmov 1983009808   ;;  %v1468_v42 = vld [vmem:[#allocation5 + $0xd4] ss:$8 sps:$4 sm:$0xff]  }
  0x39   :  { %869 = vmatpush1.bf16.msra.mxu0 %v1428_v14  ;;  %v100_v40 = vunpack.c.l.s4 %v1706_v39  ;;  %v1467_v43 = vld [vmem:[#allocation5 + $0x1e0] ss:$8 sps:$4 sm:$0xff]   ;;  %v1471_v44 = vld [vmem:[#allocation5 + $0x1d4] ss:$8 sps:$4 sm:$0xff]   ;;  %v1470_v45 = vld [vmem:[#allocation5 + $0xd0] ss:$8 sps:$4 sm:$0xff]  }
  0x3a   :  { %870 = vmatprep.subr.bf16.mxu0 %v1432_v15  ;;  %912 = vmatpush1.bf16.msra.mxu1 %v1431_v16  ;;  %v1473_v46 = vld [vmem:[#allocation5 + $0x1d0] ss:$8 sps:$4 sm:$0xff]   ;;  %v1750_v48 = vshrl.u32 %v102_v41, 7  ;;  %v1474_v49 = vld [vmem:[#allocation5 + $0xc4] ss:$8 sps:$4 sm:$0xff]   ;;  %v1707_v41 = vmov 0  }
  0x3b   :  { %913 = vmatprep.subr.bf16.mxu1 %v1435_v17  ;;  %v101_v47 = vunpack.c.0.s8 %v100_v40  ;;  %v1476_v50 = vld [vmem:[#allocation5 + $0xc0] ss:$8 sps:$4 sm:$0xff]   ;;  %v1477_v51 = vld [vmem:[#allocation5 + $0x1c4] ss:$8 sps:$4 sm:$0xff]   ;;  %v1480_v52 = vld [vmem:[#allocation5 + $0xb4] ss:$8 sps:$4 sm:$0xff]  }
  0x3c   :  { %v1479_v53 = vld [vmem:[#allocation5 + $0x1c0] ss:$8 sps:$4 sm:$0xff]   ;;  %v1482_v55 = vld [vmem:[#allocation5 + $0xb0] ss:$8 sps:$4 sm:$0xff]   ;;  %v1483_v59 = vld [vmem:[#allocation5 + $0x1b4] ss:$8 sps:$4 sm:$0xff]  }
  0x3d   :  { %871 = vmatpush1.bf16.msra.mxu0 %v1434_v18  ;;  %v1753_v54 = vsub.s32 %v101_v47, %v1750_v48  ;;  %v1503_v56 = vld [vmem:[#allocation2] ss:$14 sps:$4 sm:$0xff]   ;;  %v1505_v57 = vld [vmem:[#allocation2 + $0x1c] ss:$14 sps:$4 sm:$0xff]   ;;  %v1507_v58 = vld [vmem:[#allocation2 + $0x38] ss:$14 sps:$4 sm:$0xff]  }
  0x3e   :  { %872 = vmatprep.subr.bf16.mxu0 %v1438_v19  ;;  %914 = vmatpush1.bf16.msra.mxu1 %v1437_v20  ;;  %v1509_v60 = vld [vmem:[#allocation2 + $0x54] ss:$14 sps:$4 sm:$0xff]   ;;  %v1517_v5 = vld [vmem:[#allocation2 + $0x3c] ss:$14 sps:$4 sm:$0xff]   ;;  %v1518_v7 = vld [vmem:[#allocation2 + $0x58] ss:$14 sps:$4 sm:$0xff]  }
  0x3f   :  { %915 = vmatprep.subr.bf16.mxu1 %v1441_v21  ;;  %v1485_v61 = vld [vmem:[#allocation5 + $0x1b0] ss:$8 sps:$4 sm:$0xff]   ;;  %v1486_v62 = vld [vmem:[#allocation5 + $0xa4] ss:$8 sps:$4 sm:$0xff]   ;;  %v105_v63 = vrot.slane %v1503_v56, %v1753_v54  ;;  %v119_v0 = vrot.slane %v1505_v57, %v1753_v54  ;;  %v176_v1 = vrot.slane %v1507_v58, %v1753_v54  ;;  %v190_v2 = vrot.slane %v1509_v60, %v1753_v54  ;;  %v1488_v12 = vld [vmem:[#allocation5 + $0xa0] ss:$8 sps:$4 sm:$0xff]  }
  0x40   :  { %v1515_v3 = vld [vmem:[#allocation2 + $0x4] ss:$14 sps:$4 sm:$0xff]   ;;  %v1516_v4 = vld [vmem:[#allocation2 + $0x20] ss:$14 sps:$4 sm:$0xff]   ;;  %v183_v13 = vrot.slane %v1517_v5, %v1753_v54  ;;  %v197_v14 = vrot.slane %v1518_v7, %v1753_v54  ;;  %vm858_vm0 = vcmask 130048  }
  0x41   :  { %873 = vmatpush1.bf16.msra.mxu0 %v1440_v22  ;;  %v128_v6 = vcombine.high %v105_v63, %v119_v0  ;;  %v1489_v8 = vld [vmem:[#allocation5 + $0x1a4] ss:$8 sps:$4 sm:$0xff]   ;;  %v199_v9 = vcombine.high %v176_v1, %v190_v2  ;;  %v112_v10 = vrot.slane %v1515_v3, %v1753_v54  ;;  %v126_v11 = vrot.slane %v1516_v4, %v1753_v54  ;;  %v1492_v15 = vld [vmem:[#allocation5 + $0x94] ss:$8 sps:$4 sm:$0xff]   ;;  %v1491_v18 = vld [vmem:[#allocation5 + $0x1a0] ss:$8 sps:$4 sm:$0xff]  }
  0x42   :  { %874 = vmatprep.subr.bf16.mxu0 %v1444_v23  ;;  %916 = vmatpush1.bf16.msra.mxu1 %v1443_v24  ;;  %v201_v19 = vcombine.high %v183_v13, %v197_v14  ;;  %v1495_v20 = vld [vmem:[#allocation5 + $0x194] ss:$8 sps:$4 sm:$0xff]   ;;  %v1494_v21 = vld [vmem:[#allocation5 + $0x90] ss:$8 sps:$4 sm:$0xff]   ;;  %v1498_v23 = vld [vmem:[#allocation5 + $0x84] ss:$8 sps:$4 sm:$0xff]  }
  0x43   :  { %917 = vmatprep.subr.bf16.mxu1 %v1447_v25  ;;  %v252_v16 = vpack.c.bf16 %v199_v9, %v128_v6  ;;  %v130_v17 = vcombine.high %v112_v10, %v126_v11  ;;  %v1497_v24 = vld [vmem:[#allocation5 + $0x190] ss:$8 sps:$4 sm:$0xff]   ;;  %v1501_v25 = vld [vmem:[#allocation5 + $0x184] ss:$8 sps:$4 sm:$0xff]   ;;  %v1561_v39 = vld [vmem:[#allocation5 + $0x300] ss:$8 sps:$4 sm:$0xff]  }
  0x44   :  { %v1563_v40 = vld [vmem:[#allocation5 + $0x304] ss:$8 sps:$4 sm:$0xff]   ;;  %v1577_v57 = vld [vmem:[#allocation2 + $0x40] ss:$14 sps:$4 sm:$0xff]  }
  0x45   :  { %875 = vmatpush1.bf16.msra.mxu0 %v1446_v26  ;;  %894 = vmatprep.mubr.bf16.mxu0 %v252_v16  ;;  %v254_v22 = vpack.c.bf16 %v201_v19, %v130_v17  ;;  %v127_v26 = vcombine.low %v105_v63, %v119_v0  ;;  %v1569_v47 = vld [vmem:[#allocation2 + $0x28] ss:$14 sps:$4 sm:$0x33]   ;;  %v1576_v56 = vld [vmem:[#allocation2 + $0x24] ss:$14 sps:$4 sm:$0xff]  }
  0x46   :  { %876 = vmatprep.subr.bf16.mxu0 %v1450_v27  ;;  %918 = vmatpush1.bf16.msra.mxu1 %v1449_v28  ;;  %v198_v27 = vcombine.low %v176_v1, %v190_v2  ;;  %v1500_v28 = vld [vmem:[#allocation5 + $0x80] ss:$8 sps:$4 sm:$0xff]   ;;  %v1578_v58 = vld [vmem:[#allocation2 + $0x5c] ss:$14 sps:$4 sm:$0xff]   ;;  %v155_v0 = vrot.slane %v1576_v56, %v1753_v54  ;;  %v212_v1 = vrot.slane %v1577_v57, %v1753_v54 }
  0x47   :  { %919 = vmatprep.subr.bf16.mxu1 %v1453_v29  ;;  %937 = vmatprep.mubr.bf16.mxu1 %v254_v22  ;;  %v1514_v29 = vld [vmem:[#allocation5 + $0x274] ss:$8 sps:$4 sm:$0xff]   ;;  %v226_v2 = vrot.slane %v1578_v58, %v1753_v54  ;;  %v1531_v6 = vld [vmem:[#allocation5 + $0x220] ss:$8 sps:$4 sm:$0xff]   ;;  %v1546_v17 = vld [vmem:[#allocation5 + $0x2d0] ss:$8 sps:$4 sm:$0xff]  }
  0x48   :  { %v1548_v16 = vld [vmem:[#allocation5 + $0x2d4] ss:$8 sps:$4 sm:$0xff]   ;;  %v1549_v19 = vld [vmem:[#allocation5 + $0x2c0] ss:$8 sps:$4 sm:$0xff]   ;;  %v1557_v22 = vld [vmem:[#allocation5 + $0x2a4] ss:$8 sps:$4 sm:$0xff]  }
  0x49   :  { %877 = vmatpush1.bf16.msra.mxu0 %v1452_v30  ;;  %v129_v30 = vcombine.low %v112_v10, %v126_v11  ;;  %v235_v5 = vcombine.high %v212_v1, %v226_v2  ;;  %v1534_v10 = vld [vmem:[#allocation5 + $0x210] ss:$8 sps:$4 sm:$0xff]   ;;  %v1539_v11 = vld [vmem:[#allocation5 + $0x204] ss:$8 sps:$4 sm:$0xff]  }
  0x4a   :  { %878 = vmatprep.subr.bf16.mxu0 %v1456_v31  ;;  %920 = vmatpush1.bf16.msra.mxu1 %v1455_v32  ;;  %v200_v31 = vcombine.low %v183_v13, %v197_v14  ;;  %v1511_v32 = vld [vmem:[#allocation5 + $0x180] ss:$8 sps:$4 sm:$0xff]   ;;  %v1540_v13 = vld [vmem:[#allocation5 + $0x2f0] ss:$8 sps:$4 sm:$0xff]   ;;  %v1545_v14 = vld [vmem:[#allocation5 + $0x2e4] ss:$8 sps:$4 sm:$0xff]  }
  0x4b   :  { %921 = vmatprep.subr.bf16.mxu1 %v1459_v33  ;;  %v251_v33 = vpack.c.bf16 %v198_v27, %v127_v26  ;;  %v1566_v26 = vld [vmem:[#allocation5 + $0x284] ss:$8 sps:$4 sm:$0xff]  }
  0x4d   :  { %879 = vmatpush2.bf16.msra.mxu0 %v1458_v34  ;;  %v1512_v34 = vld [vmem:[#allocation5 + $0x270] ss:$8 sps:$4 sm:$0xff]  }
  0x4e   :  { %880 = vmatprep.subr.bf16.mxu0 %v1462_v35  ;;  %922 = vmatpush2.bf16.msra.mxu1 %v1461_v36  ;;  %v253_v35 = vpack.c.bf16 %v200_v31, %v129_v30  ;;  %v1521_v36 = vld [vmem:[#allocation5 + $0x264] ss:$8 sps:$4 sm:$0xff]  }
  0x4f   :  { %923 = vmatprep.subr.bf16.mxu1 %v1465_v37  ;;  %v1519_v37 = vld [vmem:[#allocation5 + $0x260] ss:$8 sps:$4 sm:$0xff]  }
  0x50   :  { %v1579_v31 = vld [vmem:[#allocation7 + $0x78] sm:$0xff]  }
  0x51   :  { %881 = vmatpush2.bf16.msra.mxu0 %v1464_v38  ;;  %v1524_v38 = vld [vmem:[#allocation5 + $0x254] ss:$8 sps:$4 sm:$0xff]  }
  0x52   :  { %882 = vmatprep.subr.bf16.mxu0 %v1468_v42  ;;  %924 = vmatpush2.bf16.msra.mxu1 %v1467_v43  ;;  %v1522_v42 = vld [vmem:[#allocation5 + $0x250] ss:$8 sps:$4 sm:$0xff]   ;;  %v1527_v43 = vld [vmem:[#allocation5 + $0x244] ss:$8 sps:$4 sm:$0xff]  }
  0x53   :  { %925 = vmatprep.subr.bf16.mxu1 %v1471_v44  ;;  %v1525_v44 = vld [vmem:[#allocation5 + $0x240] ss:$8 sps:$4 sm:$0xff]  }
  0x55   :  { %883 = vmatpush2.bf16.msra.mxu0 %v1470_v45  ;;  %v1567_v45 = vld [vmem:[#allocation2 + $0xc] ss:$14 sps:$4 sm:$0x33]  }
  0x56   :  { %884 = vmatprep.subr.bf16.mxu0 %v1474_v49  ;;  %926 = vmatpush2.bf16.msra.mxu1 %v1473_v46  ;;  %v1530_v46 = vld [vmem:[#allocation5 + $0x234] ss:$8 sps:$4 sm:$0xff]  }
  0x57   :  { %927 = vmatprep.subr.bf16.mxu1 %v1477_v51  ;;  %v1571_v49 = vld [vmem:[#allocation2 + $0x44] ss:$14 sps:$4 sm:$0x33]   ;;  %v1573_v51 = vld [vmem:[#allocation2 + $0x60] ss:$14 sps:$4 sm:$0x33]  }
  0x58   :  { %v233_v60 = vrot.slane %v1573_v51, %v1753_v54  ;;  %v364_v51 = vsub.s32 1, %v1750_v48 }
  0x59   :  { %885 = vmatpush2.bf16.msra.mxu0 %v1476_v50  ;;  %v148_v50 = vrot.slane %v1567_v45, %v1753_v54  ;;  %v1593_v45 = vld [vmem:[#allocation7 + $0x40] sm:$0xff]  }
  0x5a   :  { %886 = vmatprep.subr.bf16.mxu0 %v1480_v52  ;;  %928 = vmatpush2.bf16.msra.mxu1 %v1479_v53  ;;  %v1575_v52 = vld [vmem:[#allocation2 + $0x8] ss:$14 sps:$4 sm:$0xff]   ;;  %v162_v53 = vrot.slane %v1569_v47, %v1753_v54 }
  0x5b   :  { %929 = vmatprep.subr.bf16.mxu1 %v1483_v59  ;;  %v1528_v59 = vld [vmem:[#allocation5 + $0x230] ss:$8 sps:$4 sm:$0xff]  }
  0x5c   :  { %v165_v63 = vcombine.low %v148_v50, %v162_v53  ;;  %v360_v53 = vsub.s32 0, %v1750_v48 }
  0x5d   :  { %887 = vmatpush2.bf16.msra.mxu0 %v1482_v55  ;;  %v219_v55 = vrot.slane %v1571_v49, %v1753_v54 }
  0x5e   :  { %888 = vmatprep.subr.bf16.mxu0 %v1486_v62  ;;  %930 = vmatpush2.bf16.msra.mxu1 %v1485_v61  ;;  %v141_v61 = vrot.slane %v1575_v52, %v1753_v54  ;;  %v1533_v62 = vld [vmem:[#allocation5 + $0x224] ss:$8 sps:$4 sm:$0xff]   ;;  %v1537_v54 = vld [vmem:[#allocation5 + $0x200] ss:$8 sps:$4 sm:$0xff]   ;;  %v356_v52 = vld [vmem:[%s1785_s2] sm:$0x3] }
  0x5f   :  { %931 = vmatprep.subr.bf16.mxu1 %v1489_v8  ;;  %v236_v3 = vcombine.low %v219_v55, %v233_v60  ;;  %v1536_v8 = vld [vmem:[#allocation5 + $0x214] ss:$8 sps:$4 sm:$0xff]   ;;  %v365_v57 = vrot.slane %v356_v52, %v364_v51  ;;  %v361_v58 = vrot.slane %v356_v52, %v360_v53 }
  0x60   :  { %v164_v4 = vcombine.high %v141_v61, %v155_v0  ;;  %v163_v27 = vcombine.low %v141_v61, %v155_v0 }
  0x61   :  { %889 = vmatpush2.bf16.msra.mxu0 %v1488_v12  ;;  %v257_v7 = vpack.c.bf16 %v236_v3, %v165_v63  ;;  %v1542_v12 = vld [vmem:[#allocation5 + $0x2f4] ss:$8 sps:$4 sm:$0xff]  }
  0x62   :  { %890 = vmatprep.subr.bf16.mxu0 %v1492_v15  ;;  %932 = vmatpush2.bf16.msra.mxu1 %v1491_v18  ;;  %v256_v9 = vpack.c.bf16 %v235_v5, %v164_v4  ;;  %v1543_v15 = vld [vmem:[#allocation5 + $0x2e0] ss:$8 sps:$4 sm:$0xff]   ;;  %v1551_v18 = vld [vmem:[#allocation5 + $0x2c4] ss:$8 sps:$4 sm:$0xff]  }
  0x63   :  { %933 = vmatprep.subr.bf16.mxu1 %v1495_v20  ;;  %v1554_v20 = vld [vmem:[#allocation5 + $0x2b4] ss:$8 sps:$4 sm:$0xff]  }
  0x65   :  { %891 = vmatpush2.bf16.msra.mxu0 %v1494_v21  ;;  %v1552_v21 = vld [vmem:[#allocation5 + $0x2b0] ss:$8 sps:$4 sm:$0xff]  }
  0x66   :  { %892 = vmatprep.subr.bf16.mxu0 %v1498_v23  ;;  %934 = vmatpush2.bf16.msra.mxu1 %v1497_v24  ;;  %v1555_v23 = vld [vmem:[#allocation5 + $0x2a0] ss:$8 sps:$4 sm:$0xff]   ;;  %v1560_v24 = vld [vmem:[#allocation5 + $0x294] ss:$8 sps:$4 sm:$0xff]  }
  0x67   :  { %935 = vmatprep.subr.bf16.mxu1 %v1501_v25  ;;  %v1558_v25 = vld [vmem:[#allocation5 + $0x290] ss:$8 sps:$4 sm:$0xff]  }
  0x69   :  { %893 = vmatpush2.bf16.msra.mxu0 %v1500_v28  ;;  %v234_v28 = vcombine.low %v212_v1, %v226_v2 }
  0x6a   :  { %948 = vmatprep.subr.bf16.mxu0 %v1514_v29  ;;  %936 = vmatpush2.bf16.msra.mxu1 %v1511_v32  ;;  %v1564_v29 = vld [vmem:[#allocation5 + $0x280] ss:$8 sps:$4 sm:$0xff]  }
  0x6b   :  { %1005 = vmatprep.subr.bf16.mxu1 %v1563_v40  ;;  %v255_v30 = vpack.c.bf16 %v234_v28, %v163_v27  ;;  %v1580_v32 = vld [vmem:[#allocation7 + $0x38] sm:$0xff]   ;;  %v1355_v28 = vld [vmem:[%s1787_s4] ss:$0 sm:$0xff] }
  0x6c   :  { %895 = vmatmul.mubr.bf16.vlgmr.msra.gmra.mxu0 %v251_v33  ;;  %v1581_v33 = vld [vmem:[#allocation7 + $0x70] sm:$0xff]   ;;  %v1588_v40 = vld [vmem:[#allocation7 + $0x18] sm:$0xff]  }
  0x6d   :  { %949 = vmatpush1.bf16.msra.mxu0 %v1512_v34  ;;  %938 = vmatmul.mubr.bf16.vlgmr.msra.gmra.mxu1 %v253_v35  ;;  %v1582_v34 = vld [vmem:[#allocation7 + $0x30] sm:$0xff]   ;;  %v1583_v35 = vld [vmem:[#allocation7 + $0x68] sm:$0xff]  }
  0x6e   :  { %950 = vmatprep.subr.bf16.mxu0 %v1521_v36  ;;  %1023 = vmatprep.mubr.bf16.mxu1 %v1707_v41  ;;  %v1584_v36 = vld [vmem:[#allocation7 + $0x28] sm:$0xff]   ;;  %v1589_v41 = vld [vmem:[#allocation7 + $0x50] sm:$0xff]  }
  0x6f   :  { %1006 = vmatpush1.bf16.msra.mxu1 %v1561_v39  ;;  %980 = vmatprep.mubr.bf16.mxu0 %v256_v9  ;;  %v1587_v39 = vld [vmem:[#allocation7 + $0x58] sm:$0xff]  }
  0x70   :  { %1372 = vmatprep.subr.bf16.mxu1 %v1579_v31 }
  0x71   :  { %951 = vmatpush1.bf16.msra.mxu0 %v1519_v37  ;;  %v1585_v37 = vld [vmem:[#allocation7 + $0x60] sm:$0xff]  }
  0x72   :  { %952 = vmatprep.subr.bf16.mxu0 %v1524_v38  ;;  %v1586_v38 = vld [vmem:[#allocation7 + $0x20] sm:$0xff]  }
  0x75   :  { %953 = vmatpush1.bf16.msra.mxu0 %v1522_v42  ;;  %1354 = vmatmul.mubr.msk.bf16.vlgmr.msra.gmra.mxu1 %vm858_vm0, %v257_v7  ;;  %v1590_v42 = vld [vmem:[#allocation7 + $0x10] sm:$0xff]  }
  0x76   :  { %954 = vmatprep.subr.bf16.mxu0 %v1527_v43  ;;  %1373 = vmatpush3.bf16.msra.mxu1 %v1580_v32  ;;  %v1591_v43 = vld [vmem:[#allocation7 + $0x48] sm:$0xff]  }
  0x77   :  { %1374 = vmatprep.subr.bf16.mxu1 %v1581_v33 }
  0x79   :  { %955 = vmatpush1.bf16.msra.mxu0 %v1525_v44  ;;  %v1592_v44 = vld [vmem:[#allocation7 + $0x8] sm:$0xff]  }
  0x7a   :  { %956 = vmatprep.subr.bf16.mxu0 %v1530_v46  ;;  %1375 = vmatpush3.bf16.msra.mxu1 %v1582_v34  ;;  %v1594_v46 = vld [vmem:[#allocation7] sm:$0xff]  }
  0x7b   :  { %1376 = vmatprep.subr.bf16.mxu1 %v1583_v35 }
  0x7d   :  { %957 = vmatpush1.bf16.msra.mxu0 %v1528_v59 }
  0x7e   :  { %958 = vmatprep.subr.bf16.mxu0 %v1533_v62  ;;  %1377 = vmatpush3.bf16.msra.mxu1 %v1584_v36 }
  0x7f   :  { %1378 = vmatprep.subr.bf16.mxu1 %v1585_v37 }
  0x81   :  { %959 = vmatpush1.bf16.msra.mxu0 %v1531_v6 }
  0x82   :  { %960 = vmatprep.subr.bf16.mxu0 %v1536_v8  ;;  %1379 = vmatpush3.bf16.msra.mxu1 %v1586_v38 }
  0x83   :  { %1380 = vmatprep.subr.bf16.mxu1 %v1587_v39 }
  0x85   :  { %961 = vmatpush1.bf16.msra.mxu0 %v1534_v10 }
  0x86   :  { %962 = vmatprep.subr.bf16.mxu0 %v1539_v11  ;;  %1381 = vmatpush3.bf16.msra.mxu1 %v1588_v40 }
  0x87   :  { %1382 = vmatprep.subr.bf16.mxu1 %v1589_v41 }
  0x89   :  { %963 = vmatpush1.bf16.msra.mxu0 %v1537_v54 }
  0x8a   :  { %964 = vmatprep.subr.bf16.mxu0 %v1542_v12  ;;  %1383 = vmatpush3.bf16.msra.mxu1 %v1590_v42 }
  0x8b   :  { %1384 = vmatprep.subr.bf16.mxu1 %v1591_v43 }
  0x8d   :  { %965 = vmatpush2.bf16.msra.mxu0 %v1540_v13 }
  0x8e   :  { %966 = vmatprep.subr.bf16.mxu0 %v1545_v14  ;;  %1385 = vmatpush3.bf16.msra.mxu1 %v1592_v44 }
  0x8f   :  { %1386 = vmatprep.subr.bf16.mxu1 %v1593_v45 }
  0x91   :  { %967 = vmatpush2.bf16.msra.mxu0 %v1543_v15 }
  0x92   :  { %968 = vmatprep.subr.bf16.mxu0 %v1548_v16  ;;  %1387 = vmatpush3.bf16.msra.mxu1 %v1594_v46 }
  0x95   :  { %969 = vmatpush2.bf16.msra.mxu0 %v1546_v17 }
  0x96   :  { %970 = vmatprep.subr.bf16.mxu0 %v1551_v18 }
  0x99   :  { %971 = vmatpush2.bf16.msra.mxu0 %v1549_v19 }
  0x9a   :  { %972 = vmatprep.subr.bf16.mxu0 %v1554_v20 }
  0x9d   :  { %973 = vmatpush2.bf16.msra.mxu0 %v1552_v21 }
  0x9e   :  { %974 = vmatprep.subr.bf16.mxu0 %v1557_v22 }
  0xa1   :  { %975 = vmatpush2.bf16.msra.mxu0 %v1555_v23 }
  0xa2   :  { %976 = vmatprep.subr.bf16.mxu0 %v1560_v24 }
  0xa5   :  { %977 = vmatpush2.bf16.msra.mxu0 %v1558_v25 }
  0xa6   :  { %978 = vmatprep.subr.bf16.mxu0 %v1566_v26 }
  0xa9   :  { %979 = vmatpush2.bf16.msra.mxu0 %v1564_v29 }
  0xac   :  { %981 = vmatmul.mubr.bf16.vlgmr.msra.gmra.mxu0 %v255_v30 }
 0x12c   :  { %v896_v49 = vpop.f32.mrf.mxu0 }
 0x12d   :  { %v939_v47 = vpop.f32.mrf.mxu1  ;;  %v897_v63 = vadd.f32 %v896_v49, %v361_v58 }
 0x12e   :  { %v898_v55 = vpop.f32.mrf.mxu0 }
 0x12f   :  { %v941_v50 = vpop.f32.mrf.mxu1  ;;  %v899_v62 = vadd.f32 %v898_v55, %v365_v57  ;;  %v940_v6 = vadd.f32 %v939_v47, %v897_v63 }
 0x130   :  { %v900_v59 = vpop.f32.mrf.mxu0 }
 0x131   :  { %v943_v56 = vpop.f32.mrf.mxu1  ;;  %v901_v1 = vadd.f32 %v900_v59, %v361_v58  ;;  %v942_v4 = vadd.f32 %v941_v50, %v899_v62 }
 0x132   :  { %v902_v0 = vpop.f32.mrf.mxu0 }
 0x133   :  { %v945_v60 = vpop.f32.mrf.mxu1  ;;  %v903_v5 = vadd.f32 %v902_v0, %v365_v57  ;;  %v944_v8 = vadd.f32 %v943_v56, %v901_v1 }
 0x135   :  { %v1025_v61 = vpop.f32.mrf.mxu1  ;;  %v946_v54 = vadd.f32 %v945_v60, %v903_v5 }
 0x137   :  { %v1027_v2 = vpop.f32.mrf.mxu1 }
 0x139   :  { %v1029_v10 = vpop.f32.mrf.mxu1 }
 0x13b   :  { %v1031_v18 = vpop.f32.mrf.mxu1 }
 0x16c   :  { %v982_v3 = vpop.f32.mrf.mxu0 }
 0x16d   :  { %v983_v48 = vadd.f32 %v982_v3, %v940_v6 }
 0x16e   :  { %v984_v7 = vpop.f32.mrf.mxu0 }
 0x16f   :  { %v985_v9 = vadd.f32 %v984_v7, %v942_v4  ;;  %v1026_v17 = vadd.f32 %v1025_v61, %v983_v48 }
 0x170   :  { %v986_v11 = vpop.f32.mrf.mxu0 }
 0x171   :  { %v1028_v12 = vadd.f32 %v1027_v2, %v985_v9  ;;  %v987_v13 = vadd.f32 %v986_v11, %v944_v8 }
 0x172   :  { %v988_v14 = vpop.f32.mrf.mxu0 }
 0x173   :  { %v1030_v15 = vadd.f32 %v1029_v10, %v987_v13  ;;  %v989_v16 = vadd.f32 %v988_v14, %v946_v54  ;;  %1595 = vtanh.f32 %v1028_v12 }
 0x175   :  { %v1032_v19 = vadd.f32 %v1031_v18, %v989_v16  ;;  %1597 = vtanh.f32 %v1030_v15 }
 0x177   :  { %1599 = vtanh.f32 %v1032_v19 }
 0x178   :  { %1601 = vtanh.f32 %v1026_v17 }
 0x180   :  { %v1596_v20 = vpop.eup %1595 }
 0x182   :  { %v1598_v21 = vpop.eup %1597 }
 0x184   :  { %v1600_v22 = vpop.eup %1599 }
 0x185   :  { %v1602_v23 = vpop.eup %1601  ;;  %v1039_v24 = vpack.c.bf16 %v1600_v22, %v1596_v20 }
 0x186   :  { %v1038_v25 = vpack.c.bf16 %v1598_v21, %v1602_v23 }
 0x187   :  { %1207 = vmatprep.mubr.bf16.mxu1 %v1039_v24 }
 0x188   :  { %1208 = vmatmul.mubr.bf16.vlgmr.msra.gmra.mxu1 %v1038_v25 }
 0x248   :  { %v1388_v26 = vpop.f32.mrf.mxu1 }
 0x24a   :  { %v1389_v27 = vpop.f32.mrf.mxu1 }
 0x24b   :  { %v1390_v29 = vadd.f32 %v1389_v27, %v1388_v26 }
 0x24c   :  { %v1391_v30 = vpop.f32.mrf.mxu1 }
 0x24d   :  { %v1210_v31 = vadd.f32 %v1390_v29, %v1355_v28 }
 0x24e   :  { %v1392_v32 = vpop.f32.mrf.mxu1 }
 0x24f   :  { %v1393_v33 = vadd.f32 %v1392_v32, %v1391_v30  ;;  %1216 = vmax.xlane.f32.xlu0 %v1210_v31 }
 0x251   :  { %v1213_v34 = vadd.f32 %v1393_v33, %v1355_v28 }
 0x253   :  { %1218 = vmax.xlane.f32.xlu0 %v1213_v34 }
 0x2d8   :  { %v1217_v35 = vpop.xlane.xlu0 %1216 }
 0x2d9   :  { %v1220_v36 = vsub.f32 %v1210_v31, %v1217_v35 }
 0x2db   :  { %v1222_v37 = vmul.f32 1.442695, %v1220_v36 }
 0x2dc   :  { %v1219_v38 = vpop.xlane.xlu0 %1218 }
 0x2dd   :  { %v1221_v39 = vsub.f32 %v1213_v34, %v1219_v38  ;;  %1603 = vpow2.f32 %v1222_v37 }
 0x2df   :  { %v1224_v40 = vmul.f32 1.442695, %v1221_v39 }
 0x2e1   :  { %1605 = vpow2.f32 %v1224_v40 }
 0x2ea   :  { %v1604_v41 = vpop.eup %1603 }
 0x2eb   :  { %1226 = vadd.xlane.f32.xlu1 %v1604_v41 }
 0x2ee   :  { %v1606_v42 = vpop.eup %1605 }
 0x2ef   :  { %1228 = vadd.xlane.f32.xlu1 %v1606_v42 }
 0x374   :  { %v1227_v43 = vpop.xlane.xlu1 %1226 }
 0x375   :  { %1607 = vlog2.f32 %v1227_v43 }
 0x378   :  { %v1229_v44 = vpop.xlane.xlu1 %1228 }
 0x379   :  { %1609 = vlog2.f32 %v1229_v44 }
 0x382   :  { %v1608_v45 = vpop.eup %1607 }
 0x383   :  { %v1231_v46 = vmul.f32 0.6931472, %v1608_v45 }
 0x385   :  { %v1234_v47 = vsub.f32 %v1220_v36, %v1231_v46 }
 0x386   :  { %v1610_v49 = vpop.eup %1609 }
 0x387   :  { %1236 = vst [vmem:[#allocation8] sm:$0xff] %v1234_v47  ;;  %v1233_v50 = vmul.f32 0.6931472, %v1610_v49 }
 0x389   :  { %v1235_v51 = vsub.f32 %v1221_v39, %v1233_v50 }
 0x38b   :  { %1237 = vst [vmem:[#allocation8 + $0x8] sm:$0xff] %v1235_v51 }
 0x38c   :  { %1242 = vsyncadd [#allocation4], 224  ;;  %s1708_s4 = smov [#allocation8]  }
 0x38d   :  { %s1243_s15 = sshll.u32 %s1708_s4, 4  ;;  %s1244_s15 = int_to_ptr.vmem [resolvable:$true] %s1243_s15 }
 0x38e   :  { %s1671_s16 = scalar_lea.vmem %s1244_s15, 32  ;;  %s1675_s17 = scalar_lea.vmem %s1244_s15, 256 }
 0x38f   :  { %p1672_p1 = scmp.ne.s32.totalorder %s1244_s15, %s1671_s16  ;;  %p1676_p2 = scmp.lt.s32.totalorder %s1244_s15, %s1244_s15 }
 0x390   :  { %p1677_p3 = scmp.lt.s32.totalorder %s1675_s17, %s1671_s16 }
 0x392   :  { %p1678_p4 = por %p1677_p3, %p1676_p2 }
 0x394   :  { %p1679_p5 = pnand %p1678_p4, %p1672_p1 }
 0x396   :  { %1682 = shalt.err (!%p1679_p5)
}
 0x397   :  { %s1709_s18 = smov 32   ;;  %s1710_s19 = smov 2  }
 0x398   :  { %1249 = dma.vmem_to_hbm [thread:$0]  %s1244_s15, 32, %s1788_s5, [#allocation4], %s1709_s18, %s1709_s18, %s1710_s19  }
 0x399   :  { %1695 = dma.done.wait [#allocation4], 256  }
 0x39a   :  { %1696 = vsyncadd [#allocation4], 4294967040 }
 0x39b   :  { %1253 = vsyncpa [#allocation3], 1 }
 0x39c   :  { %1254 = vsyncpa [#allocation6], 1 }
 0x39d   :  { %1255 = vsyncpa [#allocation4], 1 }

</bundles_post_ra>
